<compile_context>
chip_gen: v6e
topology: v6e:2x2x1
jax: 0.10.0
libtpu: 0.0.40
codegen_flags: <defaults>
</compile_context>

<pallas_src>
import jax
import jax.numpy as jnp
from jax.experimental import pallas as pl
from jax.experimental.pallas import tpu as pltpu

_TK_HARD_CAP = 8192  # max reduction rows per grid step


def _round_up(x: int, m: int) -> int:
    return ((x + m - 1) // m) * m


def _cdiv(a: int, b: int) -> int:
    return (a + b - 1) // b


def _vmem_budget() -> tuple[int, int]:
    """(vmem_limit_bytes for CompilerParams, bytes usable for kernel buffers)."""
    phys = 64 * 1024 * 1024  # conservative fallback = v7x per-TensorCore VMEM
    try:
        info = pltpu.get_tpu_info()
        phys = int(getattr(info, "vmem_capacity_bytes", phys)) or phys
    except Exception:
        pass
    limit = min((phys * 3) // 4, 96 * 1024 * 1024)  # 48 MiB on v7x, 96 on v5e/v6e
    usable = (limit * 3) // 4                       # leave headroom for the compiler
    return limit, usable


def _feature_tile(d: int, itemsize: int) -> tuple[int, int]:
    """Pick (tile, padded_dim) for a feature dim.

    Small dims use the full (unpadded) dim; mid dims become one lane-dense
    128-multiple tile; large dims use the biggest MXU-friendly tile and are
    zero-padded up to a tile multiple (cropped again in the wrapper)."""
    tmax = 1024 if itemsize <= 2 else 512
    if d <= 128:
        return d, d            # full-dim block satisfies the (8,128) rule
    if d <= tmax:
        dp = _round_up(d, 128)  # single lane-dense tile
        return dp, dp
    dp = _round_up(d, tmax)
    return tmax, dp


def _sum_outer_kernel(x1_ref, x2_ref, o_ref, acc_ref):
    """Grid = (split, B, D1/tm, D2/tn, K); blocks (batch squeezed):
       x1_ref: (tk, tm), x2_ref: (tk, tn), o_ref / acc_ref: (tm, tn)."""
    k = pl.program_id(4)

    @pl.when(k == 0)
    def _():
        acc_ref[...] = jnp.zeros_like(acc_ref)

    # out[d1, d2] += sum_n x1[n, d1] * x2[n, d2]  ==  x1^T @ x2 on the MXU.
    acc_ref[...] += jax.lax.dot_general(
        x1_ref[...],
        x2_ref[...],
        dimension_numbers=(((0,), (0,)), ((), ())),
        preferred_element_type=jnp.float32,
    )

    @pl.when(k == pl.num_programs(4) - 1)
    def _():
        o_ref[...] = acc_ref[...].astype(o_ref.dtype)


def _sum_outer_kernel_single_k(x1_ref, x2_ref, o_ref):
    """num_k == 1 fast path: no accumulator scratch, direct store."""
    o_ref[...] = jax.lax.dot_general(
        x1_ref[...],
        x2_ref[...],
        dimension_numbers=(((0,), (0,)), ((), ())),
        preferred_element_type=jnp.float32,
    ).astype(o_ref.dtype)


def sum_flattened_outer_product(input1: jax.Array, input2: jax.Array, *,
                                reduction_tile_cap: int | None = None) -> jax.Array:
    """JAX/Pallas equivalent of SumFlattenedOuterProduct.forward((input1, input2)).

    reduction_tile_cap is a test-only hook to force a small reduction tile so
    the multi-step accumulator / split paths can be exercised at small N."""
    if input1.ndim < 3:
        input1 = input1[None]
    if input2.ndim < 3:
        input2 = input2[None]
    assert input1.ndim == 3 and input2.ndim == 3, "inputs must be (B, N, D)"

    B, N, D1 = input1.shape
    B2, N2, D2 = input2.shape
    assert B == B2 and N == N2, "batch / contraction dims must match"

    # Feed the MXU in the native (promoted) dtype; accumulate in f32 in-kernel.
    dtype = jnp.promote_types(input1.dtype, input2.dtype)
    input1 = input1.astype(dtype)
    input2 = input2.astype(dtype)
    itemsize = jnp.dtype(dtype).itemsize
    sub = max(8, 32 // itemsize)  # dtype-aware sublane packing multiple

    vmem_limit, vmem_usable = _vmem_budget()

    # Output (D1, D2) tiling (lane-dense, MXU-friendly; pad + crop).
    tm, D1p = _feature_tile(D1, itemsize)
    tn, D2p = _feature_tile(D2, itemsize)
    mi, nj = D1p // tm, D2p // tn

    # Reduction (N) tile from the VMEM budget:
    #   2 double-buffered inputs + double-buffered out + f32 acc <= usable.
    fixed = 2 * tm * tn * itemsize + tm * tn * 4
    per_row = 2 * (tm + tn) * itemsize
    tk_cap = (vmem_usable - fixed) // per_row
    tk_cap = max(sub, (tk_cap // sub) * sub)
    tk_cap = min(tk_cap, _TK_HARD_CAP)
    if reduction_tile_cap is not None:
        tk_cap = max(sub, (min(tk_cap, reduction_tile_cap) // sub) * sub)

    n_sub = _round_up(N, sub)
    single_k = n_sub <= tk_cap

    if single_k:
        split, num_k, tk, n_pad = 1, 1, n_sub, n_sub
    else:
        num_k = _cdiv(N, tk_cap)
        # 2-way reduction split so v7x's second TensorCore gets work when the
        # (batch x feature-tile) grid has a single output tile; neutral on 1-TC.
        split = 2 if (B * mi * nj == 1 and num_k >= 2) else 1
        num_k = _round_up(num_k, split)
        tk = _round_up(_cdiv(N, num_k), sub)
        n_pad = num_k * tk

    # Zero padding is neutral for the sum; padded D rows/cols are cropped below.
    if n_pad != N or D1p != D1:
        input1 = jnp.pad(input1, ((0, 0), (0, n_pad - N), (0, D1p - D1)))
    if n_pad != N or D2p != D2:
        input2 = jnp.pad(input2, ((0, 0), (0, n_pad - N), (0, D2p - D2)))

    cost = pl.CostEstimate(
        flops=2 * B * n_pad * D1p * D2p,
        transcendentals=0,
        bytes_accessed=(B * n_pad * (D1p * nj + D2p * mi)
                        + split * B * D1p * D2p) * itemsize,
    )
    compiler_params = pltpu.CompilerParams(
        dimension_semantics=(("parallel",) * 3 if single_k
                             else ("parallel",) * 4 + ("arbitrary",)),
        vmem_limit_bytes=vmem_limit,
    )

    if single_k:
        outer = pl.pallas_call(
            _sum_outer_kernel_single_k,
            out_shape=jax.ShapeDtypeStruct((B, D1p, D2p), dtype),
            grid_spec=pltpu.PrefetchScalarGridSpec(
                num_scalar_prefetch=0,
                grid=(B, mi, nj),
                in_specs=[
                    pl.BlockSpec((pl.Squeezed(), tk, tm),
                                 lambda b, i, j: (b, 0, i)),
                    pl.BlockSpec((pl.Squeezed(), tk, tn),
                                 lambda b, i, j: (b, 0, j)),
                ],
                out_specs=pl.BlockSpec((pl.Squeezed(), tm, tn),
                                       lambda b, i, j: (b, i, j)),
            ),
            compiler_params=compiler_params,
            cost_estimate=cost,
        )(input1, input2)
    else:
        kk = num_k // split  # reduction grid steps per split
        part_dtype = jnp.float32 if split > 1 else dtype
        outer = pl.pallas_call(
            _sum_outer_kernel,
            out_shape=jax.ShapeDtypeStruct((split * B, D1p, D2p), part_dtype),
            grid_spec=pltpu.PrefetchScalarGridSpec(
                num_scalar_prefetch=0,
                grid=(split, B, mi, nj, kk),
                in_specs=[
                    pl.BlockSpec((pl.Squeezed(), tk, tm),
                                 lambda s, b, i, j, k: (b, s * kk + k, i)),
                    pl.BlockSpec((pl.Squeezed(), tk, tn),
                                 lambda s, b, i, j, k: (b, s * kk + k, j)),
                ],
                out_specs=pl.BlockSpec((pl.Squeezed(), tm, tn),
                                       lambda s, b, i, j, k: (s * B + b, i, j)),
                scratch_shapes=[pltpu.VMEM((tm, tn), jnp.float32)],
            ),
            compiler_params=compiler_params,
            cost_estimate=cost,
        )(input1, input2)
        if split > 1:
            outer = outer.reshape(split, B, D1p, D2p).sum(axis=0).astype(dtype)

    # Crop feature padding; flatten (D1, D2) and add the leading unsqueeze(0)
    # (metadata-only glue, matching PyTorch's .view(B, -1).unsqueeze(0)).
    outer = outer[:, :D1, :D2]
    return outer.reshape(B, D1 * D2)[None]


if __name__ == "__main__":
    key = jax.random.PRNGKey(0)
    k1, k2, k3, k4, k5, k6, k7, k8 = jax.random.split(key, 8)

    def rnd(k, shape):
        # Snap values to bf16 so the comparison is insensitive to whichever
        # MXU precision (1/3/6-pass) the compiler picks for f32 matmuls.
        return jax.random.normal(k, shape, jnp.float32).astype(jnp.bfloat16).astype(jnp.float32)

    def ref(a, b):
        if a.ndim < 3:
            a, b = a[None], b[None]
        o = jnp.einsum("bnd,bne->bde", a, b, precision=jax.lax.Precision.HIGHEST)
        return o.reshape(o.shape[0], -1)[None]

    def check(out, expect):
        assert out.shape == expect.shape, (out.shape, expect.shape)
        err = float(jnp.max(jnp.abs(out - expect)))
        assert jnp.allclose(out, expect, atol=1e-4, rtol=1e-4), err

    # 1) 3-D inputs, single-reduction-step fast path.
    x1 = rnd(k1, (2, 8, 32))
    x2 = rnd(k2, (2, 8, 32))
    check(jax.block_until_ready(sum_flattened_outer_product(x1, x2)), ref(x1, x2))

    # 2) 2-D inputs (unsqueeze path), N not a multiple of the sublane group.
    y1 = rnd(k3, (13, 32))
    y2 = rnd(k4, (13, 16))
    check(jax.block_until_ready(sum_flattened_outer_product(y1, y2)), ref(y1, y2))

    # 3) Multi-step accumulator + 2-way reduction split (forced small tk).
    z1 = rnd(k5, (1, 40, 32))
    z2 = rnd(k6, (1, 40, 32))
    check(jax.block_until_ready(
        sum_flattened_outer_product(z1, z2, reduction_tile_cap=16)), ref(z1, z2))

    # 4) Feature dims needing padding / tiling (D1 > 512, D2 not 128-aligned).
    w1 = rnd(k7, (2, 24, 600))
    w2 = rnd(k8, (2, 24, 200))
    check(jax.block_until_ready(sum_flattened_outer_product(w1, w2)), ref(w1, w2))

    print("KERNEL_OK")
</pallas_src>

<mosaic_0001>
module attributes {stable_mosaic.version = 11 : i64} {
  func.func @_sum_outer_kernel_single_k(%arg0: i32, %arg1: i32, %arg2: i32, %arg3: memref<1x8x32xf32, #tpu.memory_space<vmem>>, %arg4: memref<1x8x32xf32, #tpu.memory_space<vmem>>, %arg5: memref<1x32x32xf32, #tpu.memory_space<vmem>>) attributes {dimension_semantics = [#tpu.dimension_semantics<parallel>, #tpu.dimension_semantics<parallel>, #tpu.dimension_semantics<parallel>], iteration_bounds = array<i64: 2, 1, 1>, scalar_prefetch = 0 : i64, scratch_operands = 0 : i64, tpu.core_type = #tpu.core_type<tc>, window_params = [{transform_indices = @transform_0, window_bounds = array<i64: 1, 8, 32>}, {transform_indices = @transform_1, window_bounds = array<i64: 1, 8, 32>}, {transform_indices = @transform_2, window_bounds = array<i64: 1, 32, 32>}]} {
    %c0 = arith.constant 0 : index
    %c0_0 = arith.constant 0 : index
    %c0_1 = arith.constant 0 : index
    %0 = vector.load %arg3[%c0, %c0_0, %c0_1] : memref<1x8x32xf32, #tpu.memory_space<vmem>>, vector<1x8x32xf32>
    %1 = vector.shape_cast %0 : vector<1x8x32xf32> to vector<8x32xf32>
    %c0_2 = arith.constant 0 : index
    %c0_3 = arith.constant 0 : index
    %c0_4 = arith.constant 0 : index
    %2 = vector.load %arg4[%c0_2, %c0_3, %c0_4] : memref<1x8x32xf32, #tpu.memory_space<vmem>>, vector<1x8x32xf32>
    %3 = vector.shape_cast %2 : vector<1x8x32xf32> to vector<8x32xf32>
    %cst = arith.constant dense<0.000000e+00> : vector<32x32xf32>
    %4 = tpu.matmul %1, %3, %cst {dimension_numbers = #tpu.dot_dimension_numbers<[0], [0], [1], [1], [0, 1, 1, 1], [], []>} : vector<8x32xf32>, vector<8x32xf32>, vector<32x32xf32> -> vector<32x32xf32>
    %c0_5 = arith.constant 0 : index
    %c0_6 = arith.constant 0 : index
    %c0_7 = arith.constant 0 : index
    %5 = vector.load %arg5[%c0_5, %c0_6, %c0_7] : memref<1x32x32xf32, #tpu.memory_space<vmem>>, vector<1x32x32xf32>
    %6 = vector.shape_cast %5 : vector<1x32x32xf32> to vector<32x32xf32>
    %7 = vector.shape_cast %4 : vector<32x32xf32> to vector<1x32x32xf32>
    tpu.vector_store %arg5[%c0_5, %c0_6, %c0_7], %7 {strides = array<i32>} : memref<1x32x32xf32, #tpu.memory_space<vmem>>, vector<1x32x32xf32>,
    return
  }
  func.func @transform_0(%arg0: i32, %arg1: i32, %arg2: i32) -> (i32, i32, i32) {
    %c0_i32 = arith.constant 0 : i32
    %c0_i32_0 = arith.constant 0 : i32
    return %arg0, %c0_i32, %arg1 : i32, i32, i32
  }
  func.func @transform_1(%arg0: i32, %arg1: i32, %arg2: i32) -> (i32, i32, i32) {
    %c0_i32 = arith.constant 0 : i32
    %c0_i32_0 = arith.constant 0 : i32
    return %arg0, %c0_i32, %arg2 : i32, i32, i32
  }
  func.func @transform_2(%arg0: i32, %arg1: i32, %arg2: i32) -> (i32, i32, i32) {
    %c0_i32 = arith.constant 0 : i32
    return %arg0, %arg1, %arg2 : i32, i32, i32
  }
}

</mosaic_0001>

<bundles_post_ra>
// kernel: tpu_custom_call.1
= control target key start
LH: loop header
LB: loop body
LE: loop exit
PB: predicated region body
PF: predicated region fallthrough
CT: control target
= control target key end

     0   :  { %7 = vsyncpa [#allocation3], 0  ;;  %s938_s0 = inlined_call_operand.hbm [shape: f32[2,8,32], index: 0, kind: input, shape index: {}]   ;;  %s939_s1 = inlined_call_operand.hbm [shape: f32[2,8,32], index: 1, kind: input, shape index: {}]   ;;  %s940_s2 = inlined_call_operand.hbm [shape: f32[2,32,32], index: 2, kind: output, shape index: {}]  }
   0x1   :  { %9 = vsyncpa [#allocation3 + $0x1], 0 }
   0x2   :  { %10 = vsyncpa [#allocation6], 0 }
   0x3   :  { %12 = vsyncpa [#allocation6 + $0x1], 0 }
   0x4   :  { %13 = vsyncpa [#allocation4], 0 }
   0x5   :  { %15 = vsyncpa [#allocation4 + $0x1], 0  ;;  %s762_s9 = smov 0   ;;  %s764_s10 = smov 0  }
   0x6   :  { %s766_s11 = smov 0   ;;  %s768_s12 = smov 0  }
   0x7   :  { %s770_s13 = smov 0   ;;  %s772_s14 = smov 0  }
   0x8 LB: > { %s493_s15 = sadd.s32 4294967295, %s740_s14   ;;  %s494_s16 = sadd.s32 4294967294, %s740_s14   ;;  %s740_s14 = sphi %s772_s14, %s21_s14   ;;  %s736_s13 = sphi %s770_s13, %s952_s13   ;;  %s732_s12 = sphi %s768_s12, %s951_s12   ;;  %s728_s11 = sphi %s766_s11, %s950_s11   ;;  %s724_s10 = sphi %s764_s10, %s949_s10   ;;  %s720_s9 = sphi %s762_s9, %s948_s9  }
   0x9   : > { %s40_s17 = sadd.s32 1, %s736_s13  ;;  %s49_s18 = sadd.s32 1, %s728_s11 }
   0xa   : > { %p42_p0 = scmp.ge.s32.totalorder %s40_s17, 2  ;;  %p56_p1 = scmp.ne.s32.totalorder %s728_s11, %s724_s10 }
   0xb   : > { %p57_p2 = scmp.eq.s32.totalorder %s740_s14, 0  ;;  %p62_p3 = scmp.ne.s32.totalorder %s724_s10, %s720_s9 }
   0xc   : > { %s954_s17 = smov (%p42_p0, %s40_s17), 0  ;;  %p63_p5 = scmp.eq.s32.totalorder %s493_s15, 0 }
   0xd   : > { %p803_p4 = por %p57_p2, %p56_p1  ;;  %s44_s20 = ssub.s32 %s736_s13, %s954_s17 }
   0xe   : > { %p118_p6 = scmp.eq.s32.totalorder %s493_s15, 1  ;;  %p47_p7 = scmp.eq.s32.totalorder %s44_s20, 0 }
   0xf   : > { %p809_p8 = por %p63_p5, %p62_p3  ;;  %p124_p10 = scmp.eq.s32.totalorder %s494_s16, 1 }
  0x10   : > { %p813_p9 = por %p118_p6, %p56_p1  ;;  %p547_p13 = scmp.lt.s32.totalorder %s740_s14, 2 }
  0x11   : > { %s818_s23 = scalar_select %p47_p7, %s728_s11, %s49_s18  }
  0x12   : > { %p820_p11 = por %p124_p10, %p62_p3  ;;  %s827_s25 = sand.u32 1, %s728_s11  }
  0x13   : > { %s497_s26 = sshll.u32 %s827_s25, 3  ;;  %s498_s27 = sshll.u32 %s736_s13, 7 }
  0x14   : > { %s154_s30 = scalar_lea.hbm %s938_s0, %s498_s27  ;;  %s148_s3 = scalar_lea.vmem [#allocation2], %s497_s26 }
  0x15   : > { %s156_s4 = sshll.u32 %s148_s3, 4  ;;  %p836_p0 = pnand %p547_p13, %p803_p4  ;;  %s157_s4 = int_to_ptr.vmem [resolvable:$true] %s156_s4 }
  0x16   : > { %p501_p1 = scmp.ge.s32.totalorder %s740_s14, 1  ;;  %p180_p2 = scmp.lt.s32.totalorder %s740_s14, 3 }
  0x17   : > { %s145_s6 = scalar_lea.sflag [#allocation3], %s827_s25  ;;  %p602_p3 = pneg %p836_p0 }
  0x18   : > { %s613_s7 = scalar_lea.vmem %s157_s4, 128  ;;  %s742_s8 = smov [#allocation2]  }
  0x19   : > { %p614_p5 = scmp.ne.s32.totalorder %s157_s4, %s613_s7  ;;  %s618_s15 = sshll.u32 %s742_s8, 4  ;;  %s619_s15 = int_to_ptr.vmem [resolvable:$false] %s618_s15 }
  0x1a   : > { %s620_s16 = scalar_lea.vmem %s619_s15, 256  ;;  %p621_p4 = scmp.lt.s32.totalorder %s157_s4, %s619_s15 }
  0x1b   : > { %p616_p6 = pnand %p614_p5, %p602_p3  ;;  %p622_p10 = scmp.lt.s32.totalorder %s620_s16, %s613_s7 }
  0x1d   : > { %p617_p7 = pneg %p616_p6  ;;  %p623_p13 = por %p622_p10, %p621_p4 }
  0x1f   : > { %p624_p12 = pnand %p623_p13, %p617_p7 }
  0x21   : > { %627 = shalt.err (!%p624_p12)
}
  0x22   : > { %539 = dma.hbm_to_vmem [thread:$0]  (!%p836_p0), %s154_s30, 128, %s157_s4, %s145_s6  }
  0x23   : > { %p854_p5 = pnand %p501_p1, %p180_p2  ;;  %s173_s28 = scalar_lea.hbm %s939_s1, %s498_s27 }
  0x24   : > { %s167_s29 = scalar_lea.vmem [#allocation5], %s497_s26  ;;  %s164_s7 = scalar_lea.sflag [#allocation6], %s827_s25 }
  0x25   : > { %s175_s3 = sshll.u32 %s167_s29, 4  ;;  %s743_s30 = smov [#allocation5]   ;;  %s176_s3 = int_to_ptr.vmem [resolvable:$true] %s175_s3 }
  0x26   : > { %s641_s8 = scalar_lea.vmem %s176_s3, 128  ;;  %s646_s4 = sshll.u32 %s743_s30, 4  ;;  %s647_s4 = int_to_ptr.vmem [resolvable:$false] %s646_s4 }
  0x27   : > { %p642_p12 = scmp.ne.s32.totalorder %s176_s3, %s641_s8  ;;  %s648_s6 = scalar_lea.vmem %s647_s4, 256 }
  0x28   : > { %p649_p1 = scmp.lt.s32.totalorder %s176_s3, %s647_s4  ;;  %p650_p2 = scmp.lt.s32.totalorder %s648_s6, %s641_s8 }
  0x29   : > { %p644_p6 = pnand %p642_p12, %p602_p3 }
  0x2a   : > { %p651_p4 = por %p650_p2, %p649_p1 }
  0x2b   : > { %p645_p7 = pneg %p644_p6 }
  0x2d   : > { %p652_p10 = pnand %p651_p4, %p645_p7 }
  0x2f   : > { %655 = shalt.err (!%p652_p10)
}
  0x30   : > { %542 = dma.hbm_to_vmem [thread:$0]  (!%p836_p0), %s173_s28, 128, %s176_s3, %s164_s7  }
  0x31   : > { %184 = sbr.rel (%p854_p5) target bundleno = 404 (0x194), region = 28  ;;  %s870_s25 = sand.u32 (!%p854_p5), 1, %s724_s10  }
  0x32   : > { %s502_s26 = sshll.u32 (!%p854_p5), %s870_s25, 3  ;;  %s187_s27 = scalar_lea.sflag (!%p854_p5), [#allocation3], %s870_s25 }
  0x33   : > { %s190_s15 = scalar_lea.vmem (!%p854_p5), [#allocation2], %s502_s26 }
  0x36   : > { %707 = dma.done.wait (%p809_p8), %s187_s27, 128  }
  0x37   : > { %709 = vsyncadd (%p809_p8), %s187_s27, 4294967168  ;;  %s196_s5 = scalar_lea.sflag [#allocation6], %s870_s25  ;;  %s199_s16 = scalar_lea.vmem [#allocation5], %s502_s26 }
  0x38   : > { %711 = dma.done.wait (%p809_p8), %s196_s5, 128  }
  0x39   : > { %713 = vsyncadd (%p809_p8), %s196_s5, 4294967168  ;;  %v226_v0 = vld [vmem:[%s190_s15] sm:$0xff]  ;;  %v227_v1 = vld [vmem:[%s199_s16] sm:$0xff]  ;;  %vm260_vm0 = vcmask 64512   ;;  %s504_s21 = sshll.u32 %s870_s25, 5  ;;  %vm358_vm1 = vcmask 261120  }
  0x3a   : > { %228 = vxpose.xlu0.b32.start.end [1/1] (short) (narrow) %v226_v0, 32  ;;  %520 = vmatprep.subr.mxu0 %v227_v1  ;;  %s224_s18 = scalar_lea.vmem [#allocation7], %s504_s21  ;;  %s514_s20 = sshll.u32 %s732_s12, 9 }
  0x3b   : > { %521 = vmatpush3.msra.mxu0 %v227_v1  ;;  %528 = vmatprep.subr.mxu1 %v227_v1  ;;  %s380_s19 = sshll.u32 %s224_s18, 4  ;;  %s890_s3 = scalar_lea.hbm %s940_s2, %s514_s20  ;;  %s885_s19 = int_to_ptr.vmem [resolvable:$true] %s380_s19 }
  0x3c   : > { %529 = vmatpush3.msra.mxu1 %v227_v1  ;;  %s364_s7 = scalar_lea.sflag [#allocation4], %s870_s25  ;;  %s656_s8 = scalar_lea.vmem %s885_s19, 512 }
  0x3d   : > { %p657_p8 = scmp.ne.s32.totalorder %s885_s19, %s656_s8  ;;  %s744_s12 = smov [#allocation7]  }
  0x3e   : > { %s660_s30 = sshll.u32 %s744_s12, 4  ;;  %s661_s30 = int_to_ptr.vmem [resolvable:$false] %s660_s30 }
  0x3f   : > { %p658_p0 = pnand %p657_p8, %p813_p9  ;;  %s662_s4 = scalar_lea.vmem %s661_s30, 1024 }
  0x40   : > { %p663_p13 = scmp.lt.s32.totalorder %s885_s19, %s661_s30  ;;  %p664_p5 = scmp.lt.s32.totalorder %s662_s4, %s656_s8 }
  0x41   : > { %p659_p3 = pneg %p658_p0 }
  0x42   : > { %p665_p12 = por %p664_p5, %p663_p13 }
  0x44   : > { %p666_p6 = pnand %p665_p12, %p659_p3 }
  0xb6   : > { %v244_v2 = vpop.trf.xlu0 }
  0xb7   : > { %522 = vmatprep.mubr.msk.f32.mxu0 %vm260_vm0, %v244_v2 }
  0xba   : > { %v245_v3 = vpop.trf.xlu0 }
  0xbb   : > { %523 = vmatmul.mubr.msk.f32.vlgmr.msra.gmra.mxu0 %vm260_vm0, %v245_v3 }
  0xbe   : > { %v246_v4 = vpop.trf.xlu0 }
  0xbf   : > { %525 = vmatprep.mubr.msk.f32.mxu1 %vm260_vm0, %v246_v4 }
  0xc2   : > { %v247_v5 = vpop.trf.xlu0 }
  0xc3   : > { %526 = vmatmul.mubr.msk.f32.vlgmr.msra.gmra.mxu1 %vm260_vm0, %v247_v5 }
 0x17b   : > { %v524_v6 = vpop.f32.mrf.mxu0 }
 0x17c   : > { %360 = vst.msk [vmem:[%s224_s18 + $0x8] sm:$0xff] %vm358_vm1, %v524_v6 }
 0x17d   : > { %v339_v7 = vpop.f32.mrf.mxu0 }
 0x17e   : > { %359 = vst.msk [vmem:[%s224_s18] sm:$0xff] %vm358_vm1, %v339_v7 }
 0x183   : > { %v527_v8 = vpop.f32.mrf.mxu1 }
 0x184   : > { %362 = vst.msk [vmem:[%s224_s18 + $0x18] sm:$0xff] %vm358_vm1, %v527_v8 }
 0x185   : > { %v349_v9 = vpop.f32.mrf.mxu1 }
 0x186   : > { %361 = vst.msk [vmem:[%s224_s18 + $0x10] sm:$0xff] %vm358_vm1, %v349_v9 }
 0x187   : > { %669 = shalt.err (!%p666_p6)
}
 0x188   : > { %s670_s6 = scalar_lea.hbm %s890_s3, 512  ;;  %s674_s15 = scalar_lea.hbm %s940_s2, 1024 }
 0x189   : > { %p671_p7 = scmp.ne.s32.totalorder %s890_s3, %s670_s6  ;;  %p675_p4 = scmp.lt.s32.totalorder %s890_s3, %s940_s2 }
 0x18a   : > { %p676_p10 = scmp.lt.s32.totalorder %s674_s15, %s670_s6 }
 0x18b   : > { %p672_p1 = pnand %p671_p7, %p813_p9 }
 0x18c   : > { %p677_p8 = por %p676_p10, %p675_p4 }
 0x18d   : > { %p673_p2 = pneg %p672_p1 }
 0x18f   : > { %p678_p0 = pnand %p677_p8, %p673_p2 }
 0x191   : > { %681 = shalt.err (!%p678_p0)
}
 0x192   : > { %s745_s21 = smov 128   ;;  %s746_s18 = smov 8  }
 0x193   : > { %534 = dma.vmem_to_hbm [thread:$0]  (%p813_p9), %s885_s19, 512, %s890_s3, %s364_s7, %s745_s21, %s745_s21, %s746_s18  }
 0x194 PF: > { %s395_s20 = sand.u32 1, %s720_s9   ;;  %p947_p3 = scmp.ge.s32.totalorder %s740_s14, 2 }
 0x195   : > { %s396_s28 = scalar_lea.sflag [#allocation4], %s395_s20 }
 0x196   : > { %p544_p13 = pnand %p947_p3, %p820_p11 }
 0x198   : > { %p545_p5 = pneg %p544_p13 }
 0x19a   : > { %715 = dma.done.wait (%p545_p5), %s396_s28, 512  }
 0x19b   : > { %717 = vsyncadd (%p545_p5), %s396_s28, 4294966784  ;;  %s21_s14 = sadd.s32 1, %s740_s14   ;;  %s948_s9 = smov %s724_s10 }
 0x19c   : > { %p18_p12 = scmp.ge.s32.totalorder %s21_s14, 4   ;;  %s949_s10 = smov %s728_s11 }
 0x19d   : > { %s950_s11 = smov %s818_s23  ;;  %s951_s12 = smov %s736_s13 }
 0x19e   : > { %s952_s13 = smov %s954_s17  ;;  %20 = sbr.rel (!%p18_p12) target bundleno = 8 (0x8), region = 86 }
 0x1a3   :  { %401 = vsyncpa [#allocation3], 1 }
 0x1a4   :  { %403 = vsyncpa [#allocation3 + $0x1], 1 }
 0x1a5   :  { %404 = vsyncpa [#allocation6], 1 }
 0x1a6   :  { %406 = vsyncpa [#allocation6 + $0x1], 1 }
 0x1a7   :  { %407 = vsyncpa [#allocation4], 1 }
 0x1a8   :  { %409 = vsyncpa [#allocation4 + $0x1], 1 }

</bundles_post_ra>
